<compile_context>
chip_gen: v7x
topology: tpu7x:2x2x1
jax: 0.10.0
libtpu: 0.0.40
codegen_flags: <defaults>
</compile_context>

<pallas_src>
import numpy as np
import jax
import jax.numpy as jnp
from jax.experimental import pallas as pl
from jax.experimental.pallas import tpu as pltpu


def _pick_tile_p(p_pad, ctot, x_itemsize, vmem_budget_bytes):
    """Largest lane-multiple pixel tile that fits the VMEM budget.

    Budget per pixel column: z inputs (f32, double-buffered) + x output
    (double-buffered) + working values / spill headroom.
    """
    per_pixel = ctot * (2 * 4 + 2 * x_itemsize + 3 * 4)
    max_tile = max(128, vmem_budget_bytes // max(per_pixel, 1))
    for cand in (8192, 4096, 2048, 1024, 512, 256, 128):
        if cand <= max_tile and p_pad % cand == 0:
            return cand
    return 128  # p_pad is always a multiple of 128


def _make_fused_kernel(level_channels, flows_per_level, tile_p, p_valid,
                       padded, trans_dtype):
    """Build the fused forward kernel.

    level_channels: cumulative channel count after each merge, e.g. (C0, 2*C0).
    Kernel ref order: [z_0..z_{L-1}, W1T_0..W1T_{F-1}, cond_0..cond_{F-1},
                       x_out, log_det_out]
    """
    n_levels = len(level_channels)
    n_flows = n_levels * flows_per_level
    use_fast = trans_dtype != np.dtype(np.float32)

    def kernel(*refs):
        z_refs = refs[:n_levels]
        w_refs = refs[n_levels:n_levels + n_flows]
        c_refs = refs[n_levels + n_flows:n_levels + 2 * n_flows]
        x_ref, ld_ref = refs[n_levels + 2 * n_flows:]

        if padded:
            # Mask the log|det| reduction on the (last) tile that holds padding.
            t = pl.program_id(1)
            lane = jax.lax.broadcasted_iota(jnp.int32, (1, tile_p), 1)
            valid = (t * tile_p + lane) < p_valid

        ld_acc = jnp.zeros((1, 1), jnp.float32)
        carried = None        # (c_prev, tile_p) f32 value, output of prev levels
        flow_idx = 0
        for lvl in range(n_levels):
            c_here = level_channels[lvl]
            # Merge (channel concat) is a value concat; log_det contribution 0.
            z_new = z_refs[lvl][...].astype(jnp.float32)
            cur = z_new if carried is None else jnp.concatenate([carried, z_new], axis=0)
            ch = c_here // 2
            lower = cur[:ch, :]
            upper = cur[ch:, :]
            # Small static unroll (2 levels x 2 flows); for many flows prefer a
            # fori_loop so live ranges stay bounded.
            for j in range(flows_per_level):
                swap = bool(j % 2)
                za, zb = (upper, lower) if swap else (lower, upper)
                w1t = w_refs[flow_idx][...].astype(jnp.float32)    # (2*ch, ch)
                cond = c_refs[flow_idx][...].astype(jnp.float32)   # (2*ch, 1)
                # h^T = W1^T @ z1^T + (onehot(s) @ W2 + b)^T, pixels on lanes.
                h = jnp.dot(w1t, za, preferred_element_type=jnp.float32) + cond
                if use_fast:
                    # bf16 tanh/exp on the EUP (v6e/v7x); affine + log_det stay f32.
                    s_lo = jnp.tanh(h[:ch, :].astype(trans_dtype))
                    scale = s_lo.astype(jnp.float32)
                    gain = jnp.exp(s_lo).astype(jnp.float32)
                else:
                    scale = jnp.tanh(h[:ch, :])
                    gain = jnp.exp(scale)
                shift = h[ch:, :]
                yb = zb * gain + shift
                if swap:
                    lower = yb
                else:
                    upper = yb
                if padded:
                    scale = jnp.where(valid, scale, 0.0)
                ld_acc = ld_acc + jnp.sum(scale, keepdims=True)
                flow_idx += 1
            carried = jnp.concatenate([lower, upper], axis=0)

        # Single store of the fully-transformed tile; no scratch copy.
        x_ref[...] = carried.astype(x_ref.dtype)
        # Per-(batch, tile) partial log|det J| (summed over tiles in JAX).
        ld_ref[...] = ld_acc

    return kernel


def sx_multiscale_forward_and_log_det(z_list, s, params, s_dim,
                                      transcendental_dtype=jnp.float32,
                                      out_dtype=None,
                                      vmem_budget_bytes=16 * 1024 * 1024):
    """Mirrors SXMultiscaleFlow.forward_and_log_det(z, s) with one fused kernel."""
    n_levels = len(params)
    flows_per_level = len(params[0])
    assert len(z_list) == n_levels
    b, _, h, w = z_list[0].shape
    p = h * w

    level_channels = []
    c_acc = 0
    for z in z_list:
        c_acc += z.shape[1]
        level_channels.append(c_acc)
    ctot = level_channels[-1]
    for c_here in level_channels:
        assert c_here % 2 == 0, "coupling split needs even channel count per level"
        assert (c_here // 2) % 8 == 0, \
            "coupling half must be a multiple of 8 channels (sublane alignment)"

    out_dtype = z_list[0].dtype if out_dtype is None else out_dtype
    x_itemsize = np.dtype(out_dtype).itemsize

    # Pad pixel count to a lane multiple: keeps output blocks lane-dense and
    # avoids a huge full-P fallback tile (v7x has only 64 MiB VMEM).
    p_pad = ((p + 127) // 128) * 128
    padded = p_pad != p

    tile_p = _pick_tile_p(p_pad, ctot, x_itemsize, vmem_budget_bytes)
    n_tiles = p_pad // tile_p

    # (B, C, H, W) -> (B, C, H*W): pure reshape, channels on sublanes,
    # pixels on lanes -- no transpose through HBM.
    z_flat = [z.reshape(b, z.shape[1], p) for z in z_list]
    if padded:
        z_flat = [jnp.pad(zf, ((0, 0), (0, 0), (0, p_pad - p))) for zf in z_flat]

    # Precompute per-batch class conditioning and transpose the 1x1-conv
    # weights once (tiny, plain JAX).
    s_onehot = jax.nn.one_hot(s, s_dim, dtype=jnp.float32)
    w1t_list, cond_list = [], []
    for lvl_params in params:
        for (w1, w2, bias) in lvl_params:
            w1t_list.append(jnp.asarray(w1, jnp.float32).T)                  # (2c2, c1)
            cond = s_onehot @ jnp.asarray(w2, jnp.float32) + jnp.asarray(bias, jnp.float32)
            cond_list.append(cond[:, :, None])                                # (B, 2c2, 1)

    kernel = _make_fused_kernel(tuple(level_channels), flows_per_level, tile_p,
                                p, padded, np.dtype(transcendental_dtype))

    z_specs = [pl.BlockSpec((None, z.shape[1], tile_p), lambda i, j: (i, 0, j))
               for z in z_flat]
    w_specs = [pl.BlockSpec(wt.shape, lambda i, j: (0, 0)) for wt in w1t_list]
    c_specs = [pl.BlockSpec((None, cd.shape[1], 1), lambda i, j: (i, 0, 0))
               for cd in cond_list]

    per_pixel = ctot * (2 * 4 + 2 * x_itemsize + 3 * 4)
    vmem_limit = int(min(48 * 1024 * 1024,
                         max(32 * 1024 * 1024, 2 * per_pixel * tile_p)))

    x_flat, ld = pl.pallas_call(
        kernel,
        out_shape=(
            jax.ShapeDtypeStruct((b, ctot, p_pad), out_dtype),
            # per-(batch, tile) partials, flattened so every block is (1,1)
            jax.ShapeDtypeStruct((b * n_tiles, 1, 1), jnp.float32),
        ),
        grid_spec=pltpu.PrefetchScalarGridSpec(
            num_scalar_prefetch=0,
            grid=(b, n_tiles),
            in_specs=z_specs + w_specs + c_specs,
            out_specs=(
                pl.BlockSpec((None, ctot, tile_p), lambda i, j: (i, 0, j)),
                pl.BlockSpec((None, 1, 1), lambda i, j: (i * n_tiles + j, 0, 0)),
            ),
        ),
        compiler_params=pltpu.CompilerParams(
            dimension_semantics=("parallel", "parallel"),
            vmem_limit_bytes=vmem_limit),
    )(*z_flat, *w1t_list, *cond_list)

    if padded:
        x_flat = x_flat[:, :, :p]
    x = x_flat.reshape(b, ctot, h, w)
    log_det = ld.reshape(b, n_tiles).sum(axis=1).astype(z_list[0].dtype)
    return x, log_det


def sx_multiscale_forward(z_list, s, params, s_dim, **kwargs):
    """Mirrors SXMultiscaleFlow.forward(z, s)."""
    x, _ = sx_multiscale_forward_and_log_det(z_list, s, params, s_dim, **kwargs)
    return x


def init_params(key, channels_per_level, s_dim, flows_per_level=2):
    params = []
    for c in channels_per_level:
        c1 = c // 2
        c2 = c - c1
        lvl = []
        for _ in range(flows_per_level):
            key, k1, k2 = jax.random.split(key, 3)
            w1 = 0.1 * jax.random.normal(k1, (c1, 2 * c2), jnp.float32)
            w2 = 0.1 * jax.random.normal(k2, (s_dim, 2 * c2), jnp.float32)
            bias = jnp.zeros((1, 2 * c2), jnp.float32)
            lvl.append((w1, w2, bias))
        params.append(lvl)
    return params


# ------------------------- pure-JAX reference (check) -------------------------
def _to_rows(z_nchw):
    b, c, h, w = z_nchw.shape
    return jnp.transpose(z_nchw, (0, 2, 3, 1)).reshape(b * h * w, c)


def _from_rows(rows, b, c, h, w):
    return rows.reshape(b, h, w, c).transpose(0, 3, 1, 2)


def _coupling_ref(z_nchw, s_onehot, params, swap):
    w1, w2, bias = params
    b, c, h, w = z_nchw.shape
    rows = _to_rows(z_nchw)
    c1 = c // 2
    if swap:
        z1, z2 = rows[:, c1:], rows[:, :c1]
    else:
        z1, z2 = rows[:, :c1], rows[:, c1:]
    s_rows = jnp.repeat(s_onehot, h * w, axis=0)
    hid = z1 @ w1 + s_rows @ w2 + bias
    c2 = z2.shape[1]
    scale = jnp.tanh(hid[:, :c2])
    shift = hid[:, c2:]
    y2 = z2 * jnp.exp(scale) + shift
    out_rows = jnp.concatenate([y2, z1], axis=1) if swap else jnp.concatenate([z1, y2], axis=1)
    return _from_rows(out_rows, b, c, h, w), scale.reshape(b, h * w * c2).sum(axis=1)


def _forward_ref(z_list, s, params, s_dim):
    b = z_list[0].shape[0]
    s_onehot = jax.nn.one_hot(s, s_dim, dtype=z_list[0].dtype)
    log_det = jnp.zeros((b,), jnp.float32)
    z_ = z_list[0]
    for i, lvl_params in enumerate(params):
        if i > 0:
            z_ = jnp.concatenate([z_, z_list[i]], axis=1)
        for j, p in enumerate(lvl_params):
            z_, ld = _coupling_ref(z_, s_onehot, p, swap=bool(j % 2))
            log_det = log_det + ld
    return z_, log_det.astype(z_list[0].dtype)
# ------------------------------------------------------------------------------


if __name__ == "__main__":
    B, C0, H, W = 2, 16, 16, 16      # z[0], z[1]: (B, C0, H, W); merged level: 2*C0
    S_DIM = 10                       # number of categorical classes for s

    key = jax.random.PRNGKey(0)
    key, kz0, kz1, ks = jax.random.split(key, 4)
    z0 = jax.random.normal(kz0, (B, C0, H, W), jnp.float32)
    z1 = jax.random.normal(kz1, (B, C0, H, W), jnp.float32)
    s = jax.random.randint(ks, (B,), 0, S_DIM)

    params = init_params(jax.random.PRNGKey(42), [C0, 2 * C0], S_DIM)
    x_ref, ld_ref = _forward_ref([z0, z1], s, params, S_DIM)

    # Exact (f32 transcendentals) path.
    fwd = jax.jit(lambda a, b_, c: sx_multiscale_forward_and_log_det(
        [a, b_], c, params, S_DIM))
    x, log_det = fwd(z0, z1, s)
    jax.block_until_ready((x, log_det))

    assert x.shape == (B, 2 * C0, H, W)
    assert log_det.shape == (B,)
    assert np.allclose(np.asarray(x), np.asarray(x_ref), rtol=1e-4, atol=1e-4), \
        "x mismatch vs reference"
    assert np.allclose(np.asarray(log_det), np.asarray(ld_ref), rtol=1e-3, atol=5e-2), \
        "log_det mismatch vs reference"

    # Fast-transcendental path (bf16 tanh/exp on the EUP -- the v6e/v7x
    # optimization).  Loose tolerance: bf16 rounding of the transcendentals only.
    fwd_fast = jax.jit(lambda a, b_, c: sx_multiscale_forward_and_log_det(
        [a, b_], c, params, S_DIM, transcendental_dtype=jnp.bfloat16))
    x_f, ld_f = fwd_fast(z0, z1, s)
    jax.block_until_ready((x_f, ld_f))
    assert np.allclose(np.asarray(x_f), np.asarray(x_ref), rtol=1e-1, atol=2e-1), \
        "x mismatch vs reference (bf16 transcendentals)"
    assert np.allclose(np.asarray(ld_f), np.asarray(ld_ref), rtol=1e-1, atol=2.0), \
        "log_det mismatch vs reference (bf16 transcendentals)"

    print("KERNEL_OK")
</pallas_src>

<mosaic_0001>
module attributes {stable_mosaic.version = 11 : i64} {
  func.func @kernel(%arg0: i32, %arg1: i32, %arg2: memref<1x16x256xf32, #tpu.memory_space<vmem>>, %arg3: memref<1x16x256xf32, #tpu.memory_space<vmem>>, %arg4: memref<16x8xf32, #tpu.memory_space<vmem>>, %arg5: memref<16x8xf32, #tpu.memory_space<vmem>>, %arg6: memref<32x16xf32, #tpu.memory_space<vmem>>, %arg7: memref<32x16xf32, #tpu.memory_space<vmem>>, %arg8: memref<1x16x1xf32, #tpu.memory_space<vmem>>, %arg9: memref<1x16x1xf32, #tpu.memory_space<vmem>>, %arg10: memref<1x32x1xf32, #tpu.memory_space<vmem>>, %arg11: memref<1x32x1xf32, #tpu.memory_space<vmem>>, %arg12: memref<1x32x256xf32, #tpu.memory_space<vmem>>, %arg13: memref<1x1x1xf32, #tpu.memory_space<vmem>>) attributes {dimension_semantics = [#tpu.dimension_semantics<parallel>, #tpu.dimension_semantics<parallel>], iteration_bounds = array<i64: 2, 1>, scalar_prefetch = 0 : i64, scratch_operands = 0 : i64, tpu.core_type = #tpu.core_type<tc>, window_params = [{transform_indices = @transform_0, window_bounds = array<i64: 1, 16, 256>}, {transform_indices = @transform_1, window_bounds = array<i64: 1, 16, 256>}, {pipeline_mode = #tpu.pipeline_mode<synchronous>, transform_indices = @transform_2, window_bounds = array<i64: 16, 8>}, {pipeline_mode = #tpu.pipeline_mode<synchronous>, transform_indices = @transform_3, window_bounds = array<i64: 16, 8>}, {pipeline_mode = #tpu.pipeline_mode<synchronous>, transform_indices = @transform_4, window_bounds = array<i64: 32, 16>}, {pipeline_mode = #tpu.pipeline_mode<synchronous>, transform_indices = @transform_5, window_bounds = array<i64: 32, 16>}, {transform_indices = @transform_6, window_bounds = array<i64: 1, 16, 1>}, {transform_indices = @transform_7, window_bounds = array<i64: 1, 16, 1>}, {transform_indices = @transform_8, window_bounds = array<i64: 1, 32, 1>}, {transform_indices = @transform_9, window_bounds = array<i64: 1, 32, 1>}, {transform_indices = @transform_10, window_bounds = array<i64: 1, 32, 256>}, {transform_indices = @transform_11, window_bounds = array<i64: 1, 1, 1>}]} {
    %cst = arith.constant 0.000000e+00 : f32
    %0 = vector.broadcast %cst : f32 to vector<1x1xf32>
    %c0 = arith.constant 0 : index
    %c0_0 = arith.constant 0 : index
    %c0_1 = arith.constant 0 : index
    %1 = vector.load %arg2[%c0, %c0_0, %c0_1] : memref<1x16x256xf32, #tpu.memory_space<vmem>>, vector<1x16x256xf32>
    %2 = vector.shape_cast %1 : vector<1x16x256xf32> to vector<16x256xf32>
    %3 = vector.extract_strided_slice %2 {offsets = [0, 0], sizes = [8, 256], strides = [1, 1]} : vector<16x256xf32> to vector<8x256xf32>
    %4 = vector.extract_strided_slice %2 {offsets = [8, 0], sizes = [8, 256], strides = [1, 1]} : vector<16x256xf32> to vector<8x256xf32>
    %c0_2 = arith.constant 0 : index
    %c0_3 = arith.constant 0 : index
    %5 = vector.load %arg4[%c0_2, %c0_3] : memref<16x8xf32, #tpu.memory_space<vmem>>, vector<16x8xf32>
    %c0_4 = arith.constant 0 : index
    %c0_5 = arith.constant 0 : index
    %c0_6 = arith.constant 0 : index
    %6 = vector.load %arg8[%c0_4, %c0_5, %c0_6] : memref<1x16x1xf32, #tpu.memory_space<vmem>>, vector<1x16x1xf32>
    %7 = vector.shape_cast %6 : vector<1x16x1xf32> to vector<16x1xf32>
    %cst_7 = arith.constant dense<0.000000e+00> : vector<16x256xf32>
    %8 = tpu.matmul %5, %3, %cst_7 {dimension_numbers = #tpu.dot_dimension_numbers<[1], [0], [0], [1], [0, 0, 1, 1], [], []>} : vector<16x8xf32>, vector<8x256xf32>, vector<16x256xf32> -> vector<16x256xf32>
    %9 = vector.broadcast %7 : vector<16x1xf32> to vector<16x256xf32>
    %10 = arith.addf %8, %9 : vector<16x256xf32>
    %11 = vector.extract_strided_slice %10 {offsets = [0, 0], sizes = [8, 256], strides = [1, 1]} : vector<16x256xf32> to vector<8x256xf32>
    %12 = math.tanh %11 : vector<8x256xf32>
    %13 = math.exp %12 : vector<8x256xf32>
    %14 = vector.extract_strided_slice %10 {offsets = [8, 0], sizes = [8, 256], strides = [1, 1]} : vector<16x256xf32> to vector<8x256xf32>
    %15 = arith.mulf %4, %13 : vector<8x256xf32>
    %16 = arith.addf %15, %14 : vector<8x256xf32>
    %17 = vector.shape_cast %12 : vector<8x256xf32> to vector<1x8x256xf32>
    %cst_8 = arith.constant dense<0.000000e+00> : vector<1xf32>
    %18 = vector.multi_reduction <add>, %17, %cst_8 [1, 2] : vector<1x8x256xf32> to vector<1xf32>
    %19 = vector.shape_cast %18 : vector<1xf32> to vector<1x1x1xf32>
    %20 = vector.extract %19[0, 0, 0] : f32 from vector<1x1x1xf32>
    %21 = vector.broadcast %20 : f32 to vector<1x1xf32>
    %22 = arith.addf %0, %21 : vector<1x1xf32>
    %c0_9 = arith.constant 0 : index
    %c0_10 = arith.constant 0 : index
    %23 = vector.load %arg5[%c0_9, %c0_10] : memref<16x8xf32, #tpu.memory_space<vmem>>, vector<16x8xf32>
    %c0_11 = arith.constant 0 : index
    %c0_12 = arith.constant 0 : index
    %c0_13 = arith.constant 0 : index
    %24 = vector.load %arg9[%c0_11, %c0_12, %c0_13] : memref<1x16x1xf32, #tpu.memory_space<vmem>>, vector<1x16x1xf32>
    %25 = vector.shape_cast %24 : vector<1x16x1xf32> to vector<16x1xf32>
    %cst_14 = arith.constant dense<0.000000e+00> : vector<16x256xf32>
    %26 = tpu.matmul %23, %16, %cst_14 {dimension_numbers = #tpu.dot_dimension_numbers<[1], [0], [0], [1], [0, 0, 1, 1], [], []>} : vector<16x8xf32>, vector<8x256xf32>, vector<16x256xf32> -> vector<16x256xf32>
    %27 = vector.broadcast %25 : vector<16x1xf32> to vector<16x256xf32>
    %28 = arith.addf %26, %27 : vector<16x256xf32>
    %29 = vector.extract_strided_slice %28 {offsets = [0, 0], sizes = [8, 256], strides = [1, 1]} : vector<16x256xf32> to vector<8x256xf32>
    %30 = math.tanh %29 : vector<8x256xf32>
    %31 = math.exp %30 : vector<8x256xf32>
    %32 = vector.extract_strided_slice %28 {offsets = [8, 0], sizes = [8, 256], strides = [1, 1]} : vector<16x256xf32> to vector<8x256xf32>
    %33 = arith.mulf %3, %31 : vector<8x256xf32>
    %34 = arith.addf %33, %32 : vector<8x256xf32>
    %35 = vector.shape_cast %30 : vector<8x256xf32> to vector<1x8x256xf32>
    %cst_15 = arith.constant dense<0.000000e+00> : vector<1xf32>
    %36 = vector.multi_reduction <add>, %35, %cst_15 [1, 2] : vector<1x8x256xf32> to vector<1xf32>
    %37 = vector.shape_cast %36 : vector<1xf32> to vector<1x1x1xf32>
    %38 = vector.extract %37[0, 0, 0] : f32 from vector<1x1x1xf32>
    %39 = vector.broadcast %38 : f32 to vector<1x1xf32>
    %40 = arith.addf %22, %39 : vector<1x1xf32>
    %41 = tpu.concatenate %34, %16 in 0 : vector<8x256xf32>, vector<8x256xf32> -> vector<16x256xf32>
    %c0_16 = arith.constant 0 : index
    %c0_17 = arith.constant 0 : index
    %c0_18 = arith.constant 0 : index
    %42 = vector.load %arg3[%c0_16, %c0_17, %c0_18] : memref<1x16x256xf32, #tpu.memory_space<vmem>>, vector<1x16x256xf32>
    %43 = vector.shape_cast %42 : vector<1x16x256xf32> to vector<16x256xf32>
    %44 = tpu.concatenate %41, %43 in 0 : vector<16x256xf32>, vector<16x256xf32> -> vector<32x256xf32>
    %45 = vector.extract_strided_slice %44 {offsets = [0, 0], sizes = [16, 256], strides = [1, 1]} : vector<32x256xf32> to vector<16x256xf32>
    %46 = vector.extract_strided_slice %44 {offsets = [16, 0], sizes = [16, 256], strides = [1, 1]} : vector<32x256xf32> to vector<16x256xf32>
    %c0_19 = arith.constant 0 : index
    %c0_20 = arith.constant 0 : index
    %47 = vector.load %arg6[%c0_19, %c0_20] : memref<32x16xf32, #tpu.memory_space<vmem>>, vector<32x16xf32>
    %c0_21 = arith.constant 0 : index
    %c0_22 = arith.constant 0 : index
    %c0_23 = arith.constant 0 : index
    %48 = vector.load %arg10[%c0_21, %c0_22, %c0_23] : memref<1x32x1xf32, #tpu.memory_space<vmem>>, vector<1x32x1xf32>
    %49 = vector.shape_cast %48 : vector<1x32x1xf32> to vector<32x1xf32>
    %cst_24 = arith.constant dense<0.000000e+00> : vector<32x256xf32>
    %50 = tpu.matmul %47, %45, %cst_24 {dimension_numbers = #tpu.dot_dimension_numbers<[1], [0], [0], [1], [0, 0, 1, 1], [], []>} : vector<32x16xf32>, vector<16x256xf32>, vector<32x256xf32> -> vector<32x256xf32>
    %51 = vector.broadcast %49 : vector<32x1xf32> to vector<32x256xf32>
    %52 = arith.addf %50, %51 : vector<32x256xf32>
    %53 = vector.extract_strided_slice %52 {offsets = [0, 0], sizes = [16, 256], strides = [1, 1]} : vector<32x256xf32> to vector<16x256xf32>
    %54 = math.tanh %53 : vector<16x256xf32>
    %55 = math.exp %54 : vector<16x256xf32>
    %56 = vector.extract_strided_slice %52 {offsets = [16, 0], sizes = [16, 256], strides = [1, 1]} : vector<32x256xf32> to vector<16x256xf32>
    %57 = arith.mulf %46, %55 : vector<16x256xf32>
    %58 = arith.addf %57, %56 : vector<16x256xf32>
    %59 = vector.shape_cast %54 : vector<16x256xf32> to vector<1x16x256xf32>
    %cst_25 = arith.constant dense<0.000000e+00> : vector<1xf32>
    %60 = vector.multi_reduction <add>, %59, %cst_25 [1, 2] : vector<1x16x256xf32> to vector<1xf32>
    %61 = vector.shape_cast %60 : vector<1xf32> to vector<1x1x1xf32>
    %62 = vector.extract %61[0, 0, 0] : f32 from vector<1x1x1xf32>
    %63 = vector.broadcast %62 : f32 to vector<1x1xf32>
    %64 = arith.addf %40, %63 : vector<1x1xf32>
    %c0_26 = arith.constant 0 : index
    %c0_27 = arith.constant 0 : index
    %65 = vector.load %arg7[%c0_26, %c0_27] : memref<32x16xf32, #tpu.memory_space<vmem>>, vector<32x16xf32>
    %c0_28 = arith.constant 0 : index
    %c0_29 = arith.constant 0 : index
    %c0_30 = arith.constant 0 : index
    %66 = vector.load %arg11[%c0_28, %c0_29, %c0_30] : memref<1x32x1xf32, #tpu.memory_space<vmem>>, vector<1x32x1xf32>
    %67 = vector.shape_cast %66 : vector<1x32x1xf32> to vector<32x1xf32>
    %cst_31 = arith.constant dense<0.000000e+00> : vector<32x256xf32>
    %68 = tpu.matmul %65, %58, %cst_31 {dimension_numbers = #tpu.dot_dimension_numbers<[1], [0], [0], [1], [0, 0, 1, 1], [], []>} : vector<32x16xf32>, vector<16x256xf32>, vector<32x256xf32> -> vector<32x256xf32>
    %69 = vector.broadcast %67 : vector<32x1xf32> to vector<32x256xf32>
    %70 = arith.addf %68, %69 : vector<32x256xf32>
    %71 = vector.extract_strided_slice %70 {offsets = [0, 0], sizes = [16, 256], strides = [1, 1]} : vector<32x256xf32> to vector<16x256xf32>
    %72 = math.tanh %71 : vector<16x256xf32>
    %73 = math.exp %72 : vector<16x256xf32>
    %74 = vector.extract_strided_slice %70 {offsets = [16, 0], sizes = [16, 256], strides = [1, 1]} : vector<32x256xf32> to vector<16x256xf32>
    %75 = arith.mulf %45, %73 : vector<16x256xf32>
    %76 = arith.addf %75, %74 : vector<16x256xf32>
    %77 = vector.shape_cast %72 : vector<16x256xf32> to vector<1x16x256xf32>
    %cst_32 = arith.constant dense<0.000000e+00> : vector<1xf32>
    %78 = vector.multi_reduction <add>, %77, %cst_32 [1, 2] : vector<1x16x256xf32> to vector<1xf32>
    %79 = vector.shape_cast %78 : vector<1xf32> to vector<1x1x1xf32>
    %80 = vector.extract %79[0, 0, 0] : f32 from vector<1x1x1xf32>
    %81 = vector.broadcast %80 : f32 to vector<1x1xf32>
    %82 = arith.addf %64, %81 : vector<1x1xf32>
    %83 = tpu.concatenate %76, %58 in 0 : vector<16x256xf32>, vector<16x256xf32> -> vector<32x256xf32>
    %c0_33 = arith.constant 0 : index
    %c0_34 = arith.constant 0 : index
    %c0_35 = arith.constant 0 : index
    %84 = vector.load %arg12[%c0_33, %c0_34, %c0_35] : memref<1x32x256xf32, #tpu.memory_space<vmem>>, vector<1x32x256xf32>
    %85 = vector.shape_cast %84 : vector<1x32x256xf32> to vector<32x256xf32>
    %86 = vector.shape_cast %83 : vector<32x256xf32> to vector<1x32x256xf32>
    tpu.vector_store %arg12[%c0_33, %c0_34, %c0_35], %86 {strides = array<i32>} : memref<1x32x256xf32, #tpu.memory_space<vmem>>, vector<1x32x256xf32>,
    %c0_36 = arith.constant 0 : index
    %c0_37 = arith.constant 0 : index
    %c0_38 = arith.constant 0 : index
    %87 = vector.load %arg13[%c0_36, %c0_37, %c0_38] : memref<1x1x1xf32, #tpu.memory_space<vmem>>, vector<1x1x1xf32>
    %88 = vector.shape_cast %87 : vector<1x1x1xf32> to vector<1x1xf32>
    %89 = vector.shape_cast %82 : vector<1x1xf32> to vector<1x1x1xf32>
    tpu.vector_store %arg13[%c0_36, %c0_37, %c0_38], %89 {strides = array<i32>} : memref<1x1x1xf32, #tpu.memory_space<vmem>>, vector<1x1x1xf32>,
    return
  }
  func.func @transform_0(%arg0: i32, %arg1: i32) -> (i32, i32, i32) {
    %c0_i32 = arith.constant 0 : i32
    %c0_i32_0 = arith.constant 0 : i32
    return %arg0, %c0_i32, %arg1 : i32, i32, i32
  }
  func.func @transform_1(%arg0: i32, %arg1: i32) -> (i32, i32, i32) {
    %c0_i32 = arith.constant 0 : i32
    %c0_i32_0 = arith.constant 0 : i32
    return %arg0, %c0_i32, %arg1 : i32, i32, i32
  }
  func.func @transform_2(%arg0: i32, %arg1: i32) -> (i32, i32) {
    %c0_i32 = arith.constant 0 : i32
    %c0_i32_0 = arith.constant 0 : i32
    %c0_i32_1 = arith.constant 0 : i32
    return %c0_i32, %c0_i32_0 : i32, i32
  }
  func.func @transform_3(%arg0: i32, %arg1: i32) -> (i32, i32) {
    %c0_i32 = arith.constant 0 : i32
    %c0_i32_0 = arith.constant 0 : i32
    %c0_i32_1 = arith.constant 0 : i32
    return %c0_i32, %c0_i32_0 : i32, i32
  }
  func.func @transform_4(%arg0: i32, %arg1: i32) -> (i32, i32) {
    %c0_i32 = arith.constant 0 : i32
    %c0_i32_0 = arith.constant 0 : i32
    %c0_i32_1 = arith.constant 0 : i32
    return %c0_i32, %c0_i32_0 : i32, i32
  }
  func.func @transform_5(%arg0: i32, %arg1: i32) -> (i32, i32) {
    %c0_i32 = arith.constant 0 : i32
    %c0_i32_0 = arith.constant 0 : i32
    %c0_i32_1 = arith.constant 0 : i32
    return %c0_i32, %c0_i32_0 : i32, i32
  }
  func.func @transform_6(%arg0: i32, %arg1: i32) -> (i32, i32, i32) {
    %c0_i32 = arith.constant 0 : i32
    %c0_i32_0 = arith.constant 0 : i32
    %c0_i32_1 = arith.constant 0 : i32
    return %arg0, %c0_i32, %c0_i32_0 : i32, i32, i32
  }
  func.func @transform_7(%arg0: i32, %arg1: i32) -> (i32, i32, i32) {
    %c0_i32 = arith.constant 0 : i32
    %c0_i32_0 = arith.constant 0 : i32
    %c0_i32_1 = arith.constant 0 : i32
    return %arg0, %c0_i32, %c0_i32_0 : i32, i32, i32
  }
  func.func @transform_8(%arg0: i32, %arg1: i32) -> (i32, i32, i32) {
    %c0_i32 = arith.constant 0 : i32
    %c0_i32_0 = arith.constant 0 : i32
    %c0_i32_1 = arith.constant 0 : i32
    return %arg0, %c0_i32, %c0_i32_0 : i32, i32, i32
  }
  func.func @transform_9(%arg0: i32, %arg1: i32) -> (i32, i32, i32) {
    %c0_i32 = arith.constant 0 : i32
    %c0_i32_0 = arith.constant 0 : i32
    %c0_i32_1 = arith.constant 0 : i32
    return %arg0, %c0_i32, %c0_i32_0 : i32, i32, i32
  }
  func.func @transform_10(%arg0: i32, %arg1: i32) -> (i32, i32, i32) {
    %c0_i32 = arith.constant 0 : i32
    %c0_i32_0 = arith.constant 0 : i32
    return %arg0, %c0_i32, %arg1 : i32, i32, i32
  }
  func.func @transform_11(%arg0: i32, %arg1: i32) -> (i32, i32, i32) {
    %c1_i32 = arith.constant 1 : i32
    %0 = arith.muli %arg0, %c1_i32 : i32
    %1 = arith.addi %0, %arg1 : i32
    %c0_i32 = arith.constant 0 : i32
    %c0_i32_0 = arith.constant 0 : i32
    %c0_i32_1 = arith.constant 0 : i32
    return %1, %c0_i32, %c0_i32_0 : i32, i32, i32
  }
}

</mosaic_0001>

<bundles_post_ra>
// kernel: _lambda_.1
= control target key start
LH: loop header
LB: loop body
LE: loop exit
PB: predicated region body
PF: predicated region fallthrough
CT: control target
= control target key end

     0   :  { %s1539_s17 = smov 0   ;;  %s1541_s18 = smov 0   ;;  %s1730_s0 = inlined_call_operand.vmem [shape: f32[2,16,256], index: 0, kind: input, shape index: {}]   ;;  %s1731_s1 = inlined_call_operand.vmem [shape: f32[2,16,256], index: 1, kind: input, shape index: {}]   ;;  %s1732_s2 = inlined_call_operand.vmem [shape: f32[16,8], index: 2, kind: input, shape index: {}]   ;;  %s1733_s3 = inlined_call_operand.vmem [shape: f32[16,8], index: 3, kind: input, shape index: {}]   ;;  %s1734_s4 = inlined_call_operand.vmem [shape: f32[32,16], index: 4, kind: input, shape index: {}]   ;;  %s1735_s5 = inlined_call_operand.vmem [shape: f32[32,16], index: 5, kind: input, shape index: {}]   ;;  %s1736_s6 = inlined_call_operand.vmem [shape: f32[2,16,1], index: 6, kind: input, shape index: {}]   ;;  %s1737_s7 = inlined_call_operand.vmem [shape: f32[2,16,1], index: 7, kind: input, shape index: {}]   ;;  %s1738_s8 = inlined_call_operand.vmem [shape: f32[2,32,1], index: 8, kind: input, shape index: {}]   ;;  %s1739_s9 = inlined_call_operand.vmem [shape: f32[2,32,1], index: 9, kind: input, shape index: {}]   ;;  %s1740_s10 = inlined_call_operand.vmem [shape: f32[2,32,256], index: 10, kind: output, shape index: {0}]   ;;  %s1741_s11 = inlined_call_operand.vmem [shape: f32[2,1,1], index: 11, kind: output, shape index: {1}]  }
   0x1   :  { %s1543_s19 = smov 0  }
   0x2 LB: > { %s34_s20 = sadd.s32 1, %s1471_s18  ;;  %p1325_p0 = scmp.ge.s32.totalorder %s1475_s19, 1  ;;  %s1475_s19 = sphi %s1543_s19, %s22_s19   ;;  %s1471_s18 = sphi %s1541_s18, %s1743_s18   ;;  %s1467_s17 = sphi %s1539_s17, %s1742_s17  }
   0x3   : > { %p36_p1 = scmp.ge.s32.totalorder %s34_s20, 2  ;;  %p420_p2 = scmp.lt.s32.totalorder %s1475_s19, 3 }
   0x5   : > { %s1745_s20 = smov (%p36_p1, %s34_s20), 0  ;;  %p421_p3 = pnand %p1325_p0, %p420_p2 }
   0x6   : > { %p502_p4 = scmp.lt.s32.totalorder (!%p421_p3), %s1467_s17, 1  ;;  %v1477_v0 = vmov (!%p421_p3), 0.0   ;;  %v1478_v1 = vmov (!%p421_p3), 0   ;;  %v560_v2 = vld [vmem:[%s1732_s2] sm:$0xff] (!%p421_p3)  ;;  %vm574_vm0 = vcmask (!%p421_p3), 64512   ;;  %v561_v7 = vld [vmem:[%s1732_s2 + $0x8] sm:$0xff] (!%p421_p3) }
   0x7   : > { %424 = sbr.rel (%p421_p3) target bundleno = 1209 (0x4b9), region = 60  ;;  %645 = vmatprep.mubr.f32.mxu0 (!%p421_p3), %v1477_v0  ;;  %1403 = vset.pattern.permute.xlu0 (!%p421_p3), %v1478_v1  ;;  %v680_v39 = vld [vmem:[%s1733_s3] sm:$0xff] (!%p421_p3)  ;;  %v681_v40 = vld [vmem:[%s1733_s3 + $0x8] sm:$0xff] (!%p421_p3)  ;;  %vm831_vm1 = vcmask (!%p421_p3), 130048   ;;  %vm1138_vm2 = vcmask (!%p421_p3), 0  }
   0x8   : > { %764 = vmatprep.mubr.f32.mxu1 (!%p421_p3), %v1477_v0  ;;  %1404 = vset.pattern.permute.xlu1 (!%p421_p3), %v1478_v1 }
   0xe   : > { %s1747_s17 = smov (!%p502_p4, %s1467_s17), 1 }
   0xf   : > { %s1562_s21 = sshll.u32 %s1747_s17, 5  ;;  %s1356_s22 = sshll.u32 %s1747_s17, 4 }
  0x10   : > { %s1569_s25 = scalar_lea.vmem %s1730_s0, %s1562_s21  ;;  %s525_s30 = scalar_lea.vmem %s1736_s6, %s1356_s22 }
  0x11   : > { %v1578_v3 = vld [vmem:[%s1569_s25 + $0x8] sm:$0xff]  ;;  %v1581_v4 = vld [vmem:[%s1569_s25] sm:$0xff]  ;;  %s535_s14 = scalar_lea.vmem %s1738_s8, %s1562_s21  ;;  %s1600_s26 = scalar_lea.vmem %s1739_s9, %s1562_s21  ;;  %v558_v28 = vld [vmem:[%s1569_s25 + $0x10] sm:$0xff] }
  0x12   : > { %v562_v5 = vld [vmem:[%s525_s30] sm:$0xff]  ;;  %581 = vmatprep.subr.mxu0 %v1578_v3  ;;  %v563_v6 = vld [vmem:[%s525_s30 + $0x8] sm:$0xff]  ;;  %v809_v9 = vld [vmem:[%s535_s14 + $0x10] sm:$0xff]  ;;  %s530_s29 = scalar_lea.vmem %s1737_s7, %s1356_s22  ;;  %s519_s30 = scalar_lea.vmem %s1731_s1, %s1562_s21 }
  0x13   : > { %566 = vperm.xlu0 %1403, %v562_v5   ;;  %582 = vmatpush1.msra.mxu0 %v1581_v4  ;;  %v807_v8 = vld [vmem:[%s535_s14] sm:$0xff]  ;;  %v683_v12 = vld [vmem:[%s530_s29 + $0x8] sm:$0xff]  ;;  %v810_v14 = vld [vmem:[%s535_s14 + $0x18] sm:$0xff]  ;;  %s554_s21 = scalar_lea.vmem %s1741_s11, %s1747_s17 }
  0x14   : > { %1340 = vmatmul.mubr.msk.f32.vlgmr.msra.gmra.mrb[0].mxu0 %vm574_vm0, %v560_v2  ;;  %v971_v10 = vld [vmem:[%s1600_s26] sm:$0xff]  ;;  %v808_v13 = vld [vmem:[%s535_s14 + $0x8] sm:$0xff]  ;;  %v559_v29 = vld [vmem:[%s1569_s25 + $0x18] sm:$0xff]  ;;  %s1360_s25 = sshll.u32 %s1747_s17, 6 }
  0x15   : > { %651 = vmatprep.mubr.f32.mxu0 %v1477_v0  ;;  %v682_v11 = vld [vmem:[%s530_s29] sm:$0xff]  ;;  %v972_v15 = vld [vmem:[%s1600_s26 + $0x8] sm:$0xff]  ;;  %s1676_s14 = scalar_lea.vmem %s1740_s10, %s1360_s25 }
  0x16   : > { %686 = vperm.xlu1 %1404, %v682_v11   ;;  %v973_v11 = vld [vmem:[%s1600_s26 + $0x10] sm:$0xff] }
  0x17   : > { %571 = vperm.xlu0 %1403, %v563_v6  }
  0x18   : > { %1341 = vmatmul.mubr.msk.f32.gmra.mrb[2].mxu0 %vm574_vm0, %v561_v7 }
  0x19   : > { %908 = vmatprep.mubr.f32.mxu0 %v1477_v0 }
  0x1a   : > { %691 = vperm.xlu1 %1404, %v683_v12  }
  0x1b   : > { %813 = vperm.xlu0 %1403, %v807_v8  }
  0x1e   : > { %818 = vperm.xlu1 %1404, %v808_v13  }
  0x1f   : > { %823 = vperm.xlu0 %1403, %v809_v9  }
  0x22   : > { %828 = vperm.xlu1 %1404, %v810_v14   ;;  %v805_v14 = vld [vmem:[%s1734_s4 + $0x10] sm:$0xff] }
  0x23   : > { %977 = vperm.xlu0 %1403, %v971_v10  }
  0x26   : > { %982 = vperm.xlu1 %1404, %v972_v15   ;;  %v806_v15 = vld [vmem:[%s1734_s4 + $0x18] sm:$0xff] }
  0x92   : > { %v567_v16 = vpop.permute.xlu0 %566 }
  0x95   : > { %v687_v51 = vpop.permute.xlu1 %686 }
  0x96   : > { %v572_v31 = vpop.permute.xlu0 %571 }
  0x99   : > { %v692_v1 = vpop.permute.xlu1 %691 }
  0x9a   : > { %v1625_v41 = vpop.permute.xlu0 %813 }
  0x9e   : > { %v1627_v42 = vpop.permute.xlu0 %823 }
  0xa2   : > { %v1629_v43 = vpop.permute.xlu0 %977 }
  0xe7   : > { %v647_v17 = vpop.f32.mrb[0].mxu0 }
  0xe8   : > { %v648_v18 = vadd.f32 %v647_v17, %v567_v16  ;;  %v649_v19 = vpop.f32.mrb[1].mxu0 }
  0xe9   : > { %v650_v20 = vadd.f32 %v649_v19, %v567_v16  ;;  %v819_v16 = vpop.permute.xlu1 %818 }
  0xea   : > { %1405 = vtanh.f32 %v648_v18 }
  0xeb   : > { %1407 = vtanh.f32 %v650_v20  ;;  %v653_v21 = vpop.f32.mrb[2].mxu0 }
  0xec   : > { %v655_v22 = vpop.f32.mrb[3].mxu0  ;;  %v654_v33 = vadd.f32 %v653_v21, %v572_v31 }
  0xed   : > { %v656_v35 = vadd.f32 %v655_v22, %v572_v31  ;;  %v1661_v17 = vpop.permute.xlu1 %828 }
  0xf1   : > { %v1663_v18 = vpop.permute.xlu1 %982 }
  0xf4   : > { %v1406_v23 = vpop.eup %1405 }
  0xf5   : > { %v1408_v24 = vpop.eup %1407  ;;  %v660_v25 = vmul.f32 1.442695, %v1406_v23 }
  0xf6   : > { %v662_v26 = vmul.f32 1.442695, %v1408_v24  ;;  %v668_v27 = vadd.f32 %v1408_v24, %v1406_v23 }
  0xf7   : > { %1409 = vpow2.f32 %v660_v25 }
  0xf8   : > { %1411 = vpow2.f32 %v662_v26  ;;  %669 = vadd.xlane.f32.xlu0 %v668_v27 }
 0x101   : > { %v1410_v30 = vpop.eup %1409 }
 0x102   : > { %v1412_v32 = vpop.eup %1411  ;;  %v664_v34 = vmul.f32 %v1410_v30, %v558_v28 }
 0x103   : > { %v665_v36 = vmul.f32 %v1412_v32, %v559_v29 }
 0x104   : > { %v1609_v37 = vadd.f32 %v664_v34, %v654_v33 }
 0x105   : > { %v1611_v38 = vadd.f32 %v665_v36, %v656_v35 }
 0x107   : > { %700 = vmatprep.subr.mxu1 %v1611_v38 }
 0x108   : > { %701 = vmatpush1.msra.mxu1 %v1609_v37 }
 0x109   : > { %1342 = vmatmul.mubr.msk.f32.vlgmr.msra.gmra.mrb[0].mxu1 %vm574_vm0, %v680_v39 }
 0x10a   : > { %770 = vmatprep.mubr.f32.mxu1 %v1477_v0 }
 0x10d   : > { %1343 = vmatmul.mubr.msk.f32.gmra.mrb[2].mxu1 %vm574_vm0, %v681_v40 }
 0x10e   : > { %1071 = vmatprep.mubr.f32.mxu1 %v1477_v0 }
 0x185   : > { %v670_v44 = vpop.xlane.xlu0 %669 }
 0x186   : > { %v671_v45 = vrot.slane %v670_v44, 4 }
 0x188   : > { %v672_v46 = vadd.f32 %v671_v45, %v670_v44 }
 0x18a   : > { %v673_v47 = vrot.slane %v672_v46, 2 }
 0x18c   : > { %v674_v48 = vadd.f32 %v673_v47, %v672_v46 }
 0x18e   : > { %v675_v49 = vrot.slane %v674_v48, 1 }
 0x190   : > { %v676_v50 = vadd.f32 %v675_v49, %v674_v48 }
 0x192   : > { %1369 = vpush %v676_v50 }
 0x1dc   : > { %v766_v52 = vpop.f32.mrb[0].mxu1 }
 0x1dd   : > { %v767_v53 = vadd.f32 %v766_v52, %v687_v51  ;;  %v768_v54 = vpop.f32.mrb[1].mxu1 }
 0x1de   : > { %v769_v55 = vadd.f32 %v768_v54, %v687_v51  ;;  %v800_v54 = vld [vmem:[%s519_s30 + $0x8] sm:$0xff] }
 0x1df   : > { %1413 = vtanh.f32 %v767_v53  ;;  %v799_v53 = vld [vmem:[%s519_s30] sm:$0xff] }
 0x1e0   : > { %1415 = vtanh.f32 %v769_v55  ;;  %v772_v56 = vpop.f32.mrb[2].mxu1 }
 0x1e1   : > { %v774_v57 = vpop.f32.mrb[3].mxu1  ;;  %v773_v5 = vadd.f32 %v772_v56, %v692_v1 }
 0x1e2   : > { %v775_v7 = vadd.f32 %v774_v57, %v692_v1 }
 0x1e9   : > { %v1414_v58 = vpop.eup %1413 }
 0x1ea   : > { %v1416_v59 = vpop.eup %1415  ;;  %v779_v60 = vmul.f32 1.442695, %v1414_v58 }
 0x1eb   : > { %v781_v61 = vmul.f32 1.442695, %v1416_v59  ;;  %v787_v62 = vadd.f32 %v1416_v59, %v1414_v58 }
 0x1ec   : > { %1417 = vpow2.f32 %v779_v60 }
 0x1ed   : > { %1419 = vpow2.f32 %v781_v61  ;;  %788 = vadd.xlane.f32.xlu1 %v787_v62  ;;  %v801_v61 = vld [vmem:[%s519_s30 + $0x10] sm:$0xff] }
 0x1f6   : > { %v1418_v63 = vpop.eup %1417 }
 0x1f7   : > { %v1420_v2 = vpop.eup %1419  ;;  %v783_v6 = vmul.f32 %v1418_v63, %v1581_v4  ;;  %v803_v4 = vld [vmem:[%s1734_s4] sm:$0xff]  ;;  %v802_v63 = vld [vmem:[%s519_s30 + $0x18] sm:$0xff] }
 0x1f8   : > { %v784_v8 = vmul.f32 %v1420_v2, %v1578_v3  ;;  %v804_v3 = vld [vmem:[%s1734_s4 + $0x8] sm:$0xff] }
 0x1f9   : > { %v1633_v9 = vadd.f32 %v783_v6, %v773_v5 }
 0x1fa   : > { %v1635_v10 = vadd.f32 %v784_v8, %v775_v7 }
 0x1fb   : > { %v1363_v13 = vpack.c.bf16 %v1609_v37, %v1633_v9 }
 0x1fc   : > { %v1361_v12 = vpack.c.bf16 %v1611_v38, %v1635_v10 }
 0x1fe   : > { %1362 = vmatprep.subr.bf16.mxu0 %v1361_v12  ;;  %987 = vperm.xlu1 %1404, %v973_v11  }
 0x1ff   : > { %1364 = vmatpush1.bf16.msra.mxu0 %v1363_v13 }
 0x202   : > { %1344 = vmatmul.mubr.msk.f32.vlgmr.msra.gmra.mrb[4].mxu0 %vm831_vm1, %v803_v4 }
 0x203   : > { %914 = vmatprep.mubr.f32.mxu0 %v1477_v0 }
 0x206   : > { %1345 = vmatmul.mubr.msk.f32.gmra.mrb[6].mxu0 %vm831_vm1, %v804_v3  ;;  %v967_v3 = vld [vmem:[%s1735_s5] sm:$0xff] }
 0x207   : > { %920 = vmatprep.mubr.f32.mxu0 %v1477_v0 }
 0x20a   : > { %1346 = vmatmul.mubr.msk.f32.gmra.mrb[8].mxu0 %vm831_vm1, %v805_v14  ;;  %v968_v14 = vld [vmem:[%s1735_s5 + $0x8] sm:$0xff] }
 0x20b   : > { %926 = vmatprep.mubr.f32.mxu0 %v1477_v0 }
 0x20e   : > { %1347 = vmatmul.mubr.msk.f32.gmra.mrb[10].mxu0 %vm831_vm1, %v806_v15  ;;  %v969_v15 = vld [vmem:[%s1735_s5 + $0x10] sm:$0xff] }
 0x27a   : > { %v789_v19 = vpop.xlane.xlu1 %788 }
 0x27b   : > { %v790_v20 = vrot.slane %v789_v19, 4 }
 0x27d   : > { %v791_v21 = vadd.f32 %v790_v20, %v789_v19 }
 0x27f   : > { %v792_v22 = vrot.slane %v791_v21, 2 }
 0x281   : > { %v793_v23 = vadd.f32 %v792_v22, %v791_v21 }
 0x283   : > { %v794_v24 = vrot.slane %v793_v23, 1 }
 0x285   : > { %v795_v25 = vadd.f32 %v794_v24, %v793_v23 }
 0x287   : > { %1371 = vpush %v795_v25 }
 0x2d5   : > { %v910_v26 = vpop.f32.mrb[4].mxu0 }
 0x2d6   : > { %v911_v27 = vadd.f32 %v910_v26, %v1625_v41  ;;  %v912_v28 = vpop.f32.mrb[5].mxu0 }
 0x2d7   : > { %v913_v29 = vadd.f32 %v912_v28, %v1625_v41 }
 0x2d8   : > { %1421 = vtanh.f32 %v911_v27 }
 0x2d9   : > { %1423 = vtanh.f32 %v913_v29  ;;  %v916_v30 = vpop.f32.mrb[6].mxu0 }
 0x2da   : > { %v917_v31 = vadd.f32 %v916_v30, %v819_v16  ;;  %v918_v32 = vpop.f32.mrb[7].mxu0 }
 0x2db   : > { %v919_v33 = vadd.f32 %v918_v32, %v819_v16  ;;  %v970_v16 = vld [vmem:[%s1735_s5 + $0x18] sm:$0xff] }
 0x2dc   : > { %1425 = vtanh.f32 %v917_v31 }
 0x2dd   : > { %1427 = vtanh.f32 %v919_v33  ;;  %v922_v34 = vpop.f32.mrb[8].mxu0 }
 0x2de   : > { %v924_v35 = vpop.f32.mrb[9].mxu0  ;;  %v923_v57 = vadd.f32 %v922_v34, %v1627_v42 }
 0x2df   : > { %v925_v59 = vadd.f32 %v924_v35, %v1627_v42 }
 0x2e1   : > { %v928_v36 = vpop.f32.mrb[10].mxu0 }
 0x2e2   : > { %v1422_v39 = vpop.eup %1421  ;;  %v930_v40 = vpop.f32.mrb[11].mxu0  ;;  %v929_v6 = vadd.f32 %v928_v36, %v1661_v17 }
 0x2e3   : > { %v1424_v44 = vpop.eup %1423  ;;  %v937_v45 = vmul.f32 1.442695, %v1422_v39  ;;  %v931_v8 = vadd.f32 %v930_v40, %v1661_v17 }
 0x2e4   : > { %v939_v46 = vmul.f32 1.442695, %v1424_v44  ;;  %v953_v47 = vadd.f32 %v1424_v44, %v1422_v39 }
 0x2e5   : > { %1429 = vpow2.f32 %v937_v45 }
 0x2e6   : > { %v1426_v41 = vpop.eup %1425  ;;  %1431 = vpow2.f32 %v939_v46 }
 0x2e7   : > { %v1428_v48 = vpop.eup %1427  ;;  %v941_v49 = vmul.f32 1.442695, %v1426_v41  ;;  %v954_v50 = vadd.f32 %v1426_v41, %v953_v47  ;;  %v988_v47 = vpop.permute.xlu1 %987 }
 0x2e8   : > { %v943_v51 = vmul.f32 1.442695, %v1428_v48 }
 0x2e9   : > { %1433 = vpow2.f32 %v941_v49  ;;  %v955_v52 = vadd.f32 %v1428_v48, %v954_v50 }
 0x2ea   : > { %1435 = vpow2.f32 %v943_v51 }
 0x2eb   : > { %956 = vadd.xlane.f32.xlu0 %v955_v52 }
 0x2ef   : > { %v1430_v55 = vpop.eup %1429 }
 0x2f0   : > { %v1432_v56 = vpop.eup %1431  ;;  %v945_v58 = vmul.f32 %v1430_v55, %v799_v53  ;;  %v974_v55 = vld [vmem:[%s1600_s26 + $0x18] sm:$0xff]  ;;  %s1370_s26 = spop %1369 }
 0x2f1   : > { %v946_v60 = vmul.f32 %v1432_v56, %v800_v54  ;;  %s1372_s22 = spop %1371 }
 0x2f2   : > { %v949_v62 = vadd.f32 %v945_v58, %v923_v57 }
 0x2f3   : > { %v1434_v1 = vpop.eup %1433  ;;  %v950_v2 = vadd.f32 %v946_v60, %v925_v59 }
 0x2f4   : > { %v1436_v5 = vpop.eup %1435  ;;  %1134 = vst [vmem:[%s1676_s14 + $0x20] sm:$0xff] %v949_v62  ;;  %v947_v7 = vmul.f32 %v1434_v1, %v801_v61 }
 0x2f5   : > { %1135 = vst [vmem:[%s1676_s14 + $0x28] sm:$0xff] %v950_v2  ;;  %v948_v11 = vmul.f32 %v1436_v5, %v802_v63 }
 0x2f6   : > { %v951_v12 = vadd.f32 %v947_v7, %v929_v6 }
 0x2f7   : > { %v952_v13 = vadd.f32 %v948_v11, %v931_v8 }
 0x2f8   : > { %v1367_v42 = vpack.c.bf16 %v951_v12, %v949_v62  ;;  %1136 = vst [vmem:[%s1676_s14 + $0x30] sm:$0xff] %v951_v12 }
 0x2f9   : > { %1137 = vst [vmem:[%s1676_s14 + $0x38] sm:$0xff] %v952_v13  ;;  %v1365_v4 = vpack.c.bf16 %v952_v13, %v950_v2 }
 0x2fb   : > { %1366 = vmatprep.subr.bf16.mxu1 %v1365_v4  ;;  %v678_v4 = vstv %s1370_s26 }
 0x2fc   : > { %1368 = vmatpush1.bf16.msra.mxu1 %v1367_v42  ;;  %v797_v42 = vstv %s1372_s22 }
 0x2ff   : > { %1348 = vmatmul.mubr.msk.f32.vlgmr.msra.gmra.mrb[4].mxu1 %vm831_vm1, %v967_v3 }
 0x300   : > { %1077 = vmatprep.mubr.f32.mxu1 %v1477_v0 }
 0x303   : > { %1349 = vmatmul.mubr.msk.f32.gmra.mrb[6].mxu1 %vm831_vm1, %v968_v14 }
 0x304   : > { %1083 = vmatprep.mubr.f32.mxu1 %v1477_v0 }
 0x307   : > { %1350 = vmatmul.mubr.msk.f32.gmra.mrb[8].mxu1 %vm831_vm1, %v969_v15 }
 0x308   : > { %1089 = vmatprep.mubr.f32.mxu1 %v1477_v0 }
 0x30b   : > { %1351 = vmatmul.mubr.msk.f32.gmra.mrb[10].mxu1 %vm831_vm1, %v970_v16 }
 0x378   : > { %v957_v17 = vpop.xlane.xlu0 %956 }
 0x379   : > { %v958_v19 = vrot.slane %v957_v17, 4 }
 0x37b   : > { %v959_v20 = vadd.f32 %v958_v19, %v957_v17 }
 0x37d   : > { %v960_v21 = vrot.slane %v959_v20, 2 }
 0x37f   : > { %v961_v22 = vadd.f32 %v960_v21, %v959_v20 }
 0x381   : > { %v962_v23 = vrot.slane %v961_v22, 1 }
 0x383   : > { %v963_v24 = vadd.f32 %v962_v23, %v961_v22 }
 0x385   : > { %1373 = vpush %v963_v24 }
 0x3b6   : > { %s1374_s30 = spop %1373 }
 0x3b7   : > { %v965_v3 = vstv %s1374_s30 }
 0x3d2   : > { %v1073_v25 = vpop.f32.mrb[4].mxu1 }
 0x3d3   : > { %v1074_v26 = vadd.f32 %v1073_v25, %v1629_v43  ;;  %v1075_v27 = vpop.f32.mrb[5].mxu1 }
 0x3d4   : > { %v1076_v0 = vadd.f32 %v1075_v27, %v1629_v43 }
 0x3d5   : > { %1437 = vtanh.f32 %v1074_v26 }
 0x3d6   : > { %1439 = vtanh.f32 %v1076_v0  ;;  %v1079_v28 = vpop.f32.mrb[6].mxu1 }
 0x3d7   : > { %v1080_v29 = vadd.f32 %v1079_v28, %v1663_v18  ;;  %v1081_v30 = vpop.f32.mrb[7].mxu1 }
 0x3d8   : > { %v1082_v31 = vadd.f32 %v1081_v30, %v1663_v18 }
 0x3d9   : > { %1441 = vtanh.f32 %v1080_v29 }
 0x3da   : > { %1443 = vtanh.f32 %v1082_v31  ;;  %v1085_v32 = vpop.f32.mrb[8].mxu1 }
 0x3db   : > { %v1087_v33 = vpop.f32.mrb[9].mxu1  ;;  %v1086_v48 = vadd.f32 %v1085_v32, %v988_v47 }
 0x3dc   : > { %v1088_v50 = vadd.f32 %v1087_v33, %v988_v47 }
 0x3de   : > { %v1091_v54 = vpop.f32.mrb[10].mxu1 }
 0x3df   : > { %v1438_v34 = vpop.eup %1437  ;;  %v1093_v56 = vpop.f32.mrb[11].mxu1 }
 0x3e0   : > { %v1440_v35 = vpop.eup %1439  ;;  %v1100_v36 = vmul.f32 1.442695, %v1438_v34 }
 0x3e1   : > { %v1102_v39 = vmul.f32 1.442695, %v1440_v35  ;;  %v1116_v40 = vadd.f32 %v1440_v35, %v1438_v34 }
 0x3e2   : > { %1445 = vpow2.f32 %v1100_v36 }
 0x3e3   : > { %v1442_v43 = vpop.eup %1441  ;;  %1447 = vpow2.f32 %v1102_v39 }
 0x3e4   : > { %v1444_v44 = vpop.eup %1443  ;;  %v1117_v45 = vadd.f32 %v1442_v43, %v1116_v40  ;;  %v1104_v57 = vmul.f32 1.442695, %v1442_v43 }
 0x3e5   : > { %v1106_v58 = vmul.f32 1.442695, %v1444_v44 }
 0x3e6   : > { %v1118_v46 = vadd.f32 %v1444_v44, %v1117_v45  ;;  %1449 = vpow2.f32 %v1104_v57 }
 0x3e7   : > { %1451 = vpow2.f32 %v1106_v58 }
 0x3e8   : > { %1119 = vadd.xlane.f32.xlu0 %v1118_v46 }
 0x3ec   : > { %v1446_v18 = vpop.eup %1445 }
 0x3ed   : > { %v1448_v41 = vpop.eup %1447  ;;  %v1108_v49 = vmul.f32 %v1446_v18, %v1633_v9 }
 0x3ee   : > { %v1109_v51 = vmul.f32 %v1448_v41, %v1635_v10 }
 0x3ef   : > { %v1112_v52 = vadd.f32 %v1108_v49, %v1086_v48 }
 0x3f0   : > { %v1113_v53 = vadd.f32 %v1109_v51, %v1088_v50  ;;  %v1450_v61 = vpop.eup %1449 }
 0x3f1   : > { %1130 = vst [vmem:[%s1676_s14] sm:$0xff] %v1112_v52  ;;  %v1452_v10 = vpop.eup %1451  ;;  %v1110_v1 = vmul.f32 %v1450_v61, %v1609_v37  ;;  %v798_v37 = vadd.f32 %v797_v42, %v678_v4 }
 0x3f2   : > { %1131 = vst [vmem:[%s1676_s14 + $0x8] sm:$0xff] %v1113_v53  ;;  %v1111_v5 = vmul.f32 %v1452_v10, %v1611_v38 }
 0x3f3   : > { %v966_v14 = vadd.f32 %v965_v3, %v798_v37 }
 0x3fe   : > { %992 = vperm.xlu0 %1403, %v974_v55  }
 0x475   : > { %v1120_v59 = vpop.xlane.xlu0 %1119 }
 0x476   : > { %v1121_v60 = vrot.slane %v1120_v59, 4 }
 0x478   : > { %v1122_v9 = vadd.f32 %v1121_v60, %v1120_v59 }
 0x47a   : > { %v1123_v62 = vrot.slane %v1122_v9, 2 }
 0x47c   : > { %v1124_v63 = vadd.f32 %v1123_v62, %v1122_v9 }
 0x47d   : > { %v993_v2 = vpop.permute.xlu0 %992 }
 0x47e   : > { %v1092_v6 = vadd.f32 %v1091_v54, %v993_v2  ;;  %v1094_v7 = vadd.f32 %v1093_v56, %v993_v2  ;;  %v1125_v8 = vrot.slane %v1124_v63, 1 }
 0x480   : > { %v1114_v11 = vadd.f32 %v1110_v1, %v1092_v6  ;;  %v1115_v12 = vadd.f32 %v1111_v5, %v1094_v7  ;;  %v1126_v13 = vadd.f32 %v1125_v8, %v1124_v63 }
 0x482   : > { %1132 = vst [vmem:[%s1676_s14 + $0x10] sm:$0xff] %v1114_v11  ;;  %1133 = vst [vmem:[%s1676_s14 + $0x18] sm:$0xff] %v1115_v12 }
 0x483   : > { %1375 = vpush %v1126_v13 }
 0x4b4   : > { %s1376_s25 = spop %1375 }
 0x4b5   : > { %v1128_v38 = vstv %s1376_s25 }
 0x4b6   : > { %v1129_v15 = vadd.f32 %v1128_v38, %v966_v14 }
 0x4b8   : > { %1139 = vst.msk [vmem:[%s554_s21] sm:$0x1] %vm1138_vm2, %v1129_v15 }
 0x4b9 PF: > { %s22_s19 = sadd.s32 1, %s1475_s19   ;;  %s1742_s17 = smov %s1471_s18 }
 0x4ba   : > { %p19_p5 = scmp.ge.s32.totalorder %s22_s19, 4   ;;  %s1743_s18 = smov %s1745_s20 }
 0x4bc   :  { %21 = sbr.rel (!%p19_p5) target bundleno = 2 (0x2), region = 117 }

</bundles_post_ra>
